<compile_context>
chip_gen: v7x
topology: tpu7x:2x2x1
jax: 0.10.0
libtpu: 0.0.40
codegen_flags: <defaults>
</compile_context>

<pallas_src>
import jax
import jax.numpy as jnp
from jax.experimental import pallas as pl
from jax.experimental.pallas import tpu as pltpu


def _exchange_kernel(m1_ref, m2_ref, x0_ref, x1_ref, o1_ref, o2_ref):
    # m*_ref: (BR, 1) float32 gate, 1.0 -> keep own stream, 0.0 -> use product
    # x*_ref: (BR, BL) activations; lane axis = flattened (padded) H*W (lane-dense)
    x0 = x0_ref[...]
    x1 = x1_ref[...]
    prod = x0 * x1                       # VPU; shared by both outputs
    keep1 = m1_ref[...] > 0.0            # (BR, 1) -> broadcasts along lanes
    keep2 = m2_ref[...] > 0.0
    o1_ref[...] = jnp.where(keep1, x0, prod).astype(o1_ref.dtype)
    o2_ref[...] = jnp.where(keep2, x1, prod).astype(o2_ref.dtype)


def _round_up(x, m):
    return ((x + m - 1) // m) * m


def _choose_blocks(R, L, itemsize, budget_bytes=2 * 1024 * 1024):
    """Byte-budgeted, (sublane,128)-aligned block sizes; full-row blocks preferred."""
    sub_align = 8 * max(1, 4 // itemsize)          # 8 (f32) / 16 (bf16) / 32 (int8/fp8)
    L_pad = _round_up(L, 128)
    R_pad = _round_up(R, sub_align)

    if sub_align * L_pad * itemsize <= budget_bytes:
        # Full (contiguous) rows per block; as many aligned row-groups as fit budget.
        BL = L_pad
        BR = (budget_bytes // (BL * itemsize)) // sub_align * sub_align
        BR = max(sub_align, min(BR, R_pad))
    else:
        # A single aligned row-group already exceeds the budget: tile lanes too.
        BR = sub_align
        BL = (budget_bytes // (BR * itemsize)) // 128 * 128
        BL = max(128, min(BL, L_pad))

    # Megacore: ensure >= 2 blocks along a parallel axis when feasible so both
    # v7x TensorCores stream HBM (a (1,1) grid pins all work on one core).
    if pl.cdiv(R_pad, BR) * pl.cdiv(L_pad, BL) == 1:
        if L_pad >= 256:
            BL = max(128, (L_pad // 2) // 128 * 128)
        elif R_pad >= 2 * sub_align:
            BR = max(sub_align, (R_pad // 2) // sub_align * sub_align)

    return BR, BL


def exchange_pallas(x_pair, insnorm_weights, threshold=None, *, donate=False):
    """x_pair: [x0, x1], each (N, C, H, W). insnorm_weights: [w0, w1], each (C,).

    `threshold` is accepted for signature parity with the PyTorch forward but,
    exactly like the reference, it is never used.
    """
    del threshold  # unused in the reference forward as well
    x0, x1 = x_pair
    w1, w2 = insnorm_weights
    N, C, H, W = x0.shape
    R, L = N * C, H * W
    itemsize = jnp.dtype(x0.dtype).itemsize

    # --- per-channel gate (C-length scalar work; never touches activations) ---
    a1, a2 = jnp.abs(w1), jnp.abs(w2)
    thr = a1.min() + 0.05 * (a1.max() - a1.min())
    _thr2 = a2.min() + 0.05 * (a2.max() - a2.min())  # computed but unused (reference fidelity)
    m1 = (a1 >= thr).astype(jnp.float32)
    m2 = (a2 >= thr).astype(jnp.float32)             # reference compares against thr, not thr2
    m1_rows = jnp.broadcast_to(m1[None, :], (N, C)).reshape(R, 1)
    m2_rows = jnp.broadcast_to(m2[None, :], (N, C)).reshape(R, 1)

    # --- block sizes (byte-budgeted, aligned) and padded lane-dense layout ---
    BR, BL = _choose_blocks(R, L, itemsize)
    R_pad = _round_up(R, BR)
    L_pad = _round_up(L, BL)
    grid = (R_pad // BR, L_pad // BL)    # lane axis innermost

    x0_2d = x0.reshape(R, L)             # free contiguous reshape (no transpose)
    x1_2d = x1.reshape(R, L)
    if (R_pad, L_pad) != (R, L):
        # Awkward shapes (e.g. 7x7 spatial, prime N*C): zero-pad once in the wrapper
        # so every block stays lane-dense and (8,128)-aligned; slice padding off after.
        pad = ((0, R_pad - R), (0, L_pad - L))
        x0_2d = jnp.pad(x0_2d, pad)
        x1_2d = jnp.pad(x1_2d, pad)
        m1_rows = jnp.pad(m1_rows, ((0, R_pad - R), (0, 0)))
        m2_rows = jnp.pad(m2_rows, ((0, R_pad - R), (0, 0)))

    extra_kwargs = {}
    if donate:
        # Caller donates the activations: alias them onto the outputs.
        extra_kwargs["input_output_aliases"] = {2: 0, 3: 1}

    out1, out2 = pl.pallas_call(
        _exchange_kernel,
        out_shape=(
            jax.ShapeDtypeStruct((R_pad, L_pad), x0.dtype),
            jax.ShapeDtypeStruct((R_pad, L_pad), x1.dtype),
        ),
        grid=grid,
        in_specs=[
            pl.BlockSpec((BR, 1), lambda i, j: (i, 0)),
            pl.BlockSpec((BR, 1), lambda i, j: (i, 0)),
            pl.BlockSpec((BR, BL), lambda i, j: (i, j)),
            pl.BlockSpec((BR, BL), lambda i, j: (i, j)),
        ],
        out_specs=(
            pl.BlockSpec((BR, BL), lambda i, j: (i, j)),
            pl.BlockSpec((BR, BL), lambda i, j: (i, j)),
        ),
        compiler_params=pltpu.CompilerParams(
            dimension_semantics=("parallel", "parallel"),
            vmem_limit_bytes=32 * 1024 * 1024,   # safe on v5e/v6e/v7x; fits budgeted tiles
        ),
        **extra_kwargs,
    )(m1_rows, m2_rows, x0_2d, x1_2d)

    out1 = out1[:R, :L].reshape(N, C, H, W)
    out2 = out2[:R, :L].reshape(N, C, H, W)
    return [out1, out2]


def _exchange_ref(x0, x1, w1, w2):
    # Pure-JAX reference following the PyTorch code line by line.
    a1, a2 = jnp.abs(w1), jnp.abs(w2)
    thr = a1.min() + 0.05 * (a1.max() - a1.min())
    m1 = (a1 >= thr)[None, :, None, None]
    m2 = (a2 >= thr)[None, :, None, None]
    prod = x0 * x1
    return [jnp.where(m1, x0, prod), jnp.where(m2, x1, prod)]


if __name__ == "__main__":
    N, C, H, W = 2, 4, 16, 16

    key = jax.random.PRNGKey(0)
    k0, k1, kw1, kw2 = jax.random.split(key, 4)
    x0 = jax.random.normal(k0, (N, C, H, W), jnp.float32)
    x1 = jax.random.normal(k1, (N, C, H, W), jnp.float32)
    # instance-norm affine weights (random so both mask branches are exercised)
    w1 = jax.random.normal(kw1, (C,), jnp.float32)
    w2 = jax.random.normal(kw2, (C,), jnp.float32)

    outs = exchange_pallas([x0, x1], [w1, w2], threshold=0.05)
    outs = [jax.block_until_ready(o) for o in outs]

    refs = _exchange_ref(x0, x1, w1, w2)
    for o, r in zip(outs, refs):
        assert o.shape == (N, C, H, W)
        assert jnp.allclose(o, r, atol=1e-6, rtol=1e-6)

    print("KERNEL_OK")
</pallas_src>

<mosaic_0001>
module attributes {stable_mosaic.version = 11 : i64} {
  func.func @_exchange_kernel(%arg0: i32, %arg1: i32, %arg2: memref<8x1xf32, #tpu.memory_space<vmem>>, %arg3: memref<8x1xf32, #tpu.memory_space<vmem>>, %arg4: memref<8x128xf32, #tpu.memory_space<vmem>>, %arg5: memref<8x128xf32, #tpu.memory_space<vmem>>, %arg6: memref<8x128xf32, #tpu.memory_space<vmem>>, %arg7: memref<8x128xf32, #tpu.memory_space<vmem>>) attributes {dimension_semantics = [#tpu.dimension_semantics<parallel>, #tpu.dimension_semantics<parallel>], iteration_bounds = array<i64: 1, 2>, scalar_prefetch = 0 : i64, scratch_operands = 0 : i64, tpu.core_type = #tpu.core_type<tc>, window_params = [{transform_indices = @transform_0, window_bounds = array<i64: 8, 1>}, {transform_indices = @transform_1, window_bounds = array<i64: 8, 1>}, {transform_indices = @transform_2, window_bounds = array<i64: 8, 128>}, {transform_indices = @transform_3, window_bounds = array<i64: 8, 128>}, {transform_indices = @transform_4, window_bounds = array<i64: 8, 128>}, {transform_indices = @transform_5, window_bounds = array<i64: 8, 128>}]} {
    %c0 = arith.constant 0 : index
    %c0_0 = arith.constant 0 : index
    %0 = vector.load %arg4[%c0, %c0_0] : memref<8x128xf32, #tpu.memory_space<vmem>>, vector<8x128xf32>
    %c0_1 = arith.constant 0 : index
    %c0_2 = arith.constant 0 : index
    %1 = vector.load %arg5[%c0_1, %c0_2] : memref<8x128xf32, #tpu.memory_space<vmem>>, vector<8x128xf32>
    %2 = arith.mulf %0, %1 : vector<8x128xf32>
    %c0_3 = arith.constant 0 : index
    %c0_4 = arith.constant 0 : index
    %3 = vector.load %arg2[%c0_3, %c0_4] : memref<8x1xf32, #tpu.memory_space<vmem>>, vector<8x1xf32>
    %cst = arith.constant 0.000000e+00 : f32
    %4 = vector.broadcast %cst : f32 to vector<8x1xf32>
    %5 = arith.cmpf ogt, %3, %4 : vector<8x1xf32>
    %c0_5 = arith.constant 0 : index
    %c0_6 = arith.constant 0 : index
    %6 = vector.load %arg3[%c0_5, %c0_6] : memref<8x1xf32, #tpu.memory_space<vmem>>, vector<8x1xf32>
    %cst_7 = arith.constant 0.000000e+00 : f32
    %7 = vector.broadcast %cst_7 : f32 to vector<8x1xf32>
    %8 = arith.cmpf ogt, %6, %7 : vector<8x1xf32>
    %9 = vector.shape_cast %5 : vector<8x1xi1> to vector<8x1xi1>
    %10 = vector.broadcast %9 : vector<8x1xi1> to vector<8x128xi1>
    %11 = arith.select %10, %0, %2 : vector<8x128xi1>, vector<8x128xf32>
    %c0_8 = arith.constant 0 : index
    %c0_9 = arith.constant 0 : index
    %12 = vector.load %arg6[%c0_8, %c0_9] : memref<8x128xf32, #tpu.memory_space<vmem>>, vector<8x128xf32>
    tpu.vector_store %arg6[%c0_8, %c0_9], %11 {strides = array<i32>} : memref<8x128xf32, #tpu.memory_space<vmem>>, vector<8x128xf32>,
    %13 = vector.shape_cast %8 : vector<8x1xi1> to vector<8x1xi1>
    %14 = vector.broadcast %13 : vector<8x1xi1> to vector<8x128xi1>
    %15 = arith.select %14, %1, %2 : vector<8x128xi1>, vector<8x128xf32>
    %c0_10 = arith.constant 0 : index
    %c0_11 = arith.constant 0 : index
    %16 = vector.load %arg7[%c0_10, %c0_11] : memref<8x128xf32, #tpu.memory_space<vmem>>, vector<8x128xf32>
    tpu.vector_store %arg7[%c0_10, %c0_11], %15 {strides = array<i32>} : memref<8x128xf32, #tpu.memory_space<vmem>>, vector<8x128xf32>,
    return
  }
  func.func @transform_0(%arg0: i32, %arg1: i32) -> (i32, i32) {
    %c0_i32 = arith.constant 0 : i32
    %c0_i32_0 = arith.constant 0 : i32
    return %arg0, %c0_i32 : i32, i32
  }
  func.func @transform_1(%arg0: i32, %arg1: i32) -> (i32, i32) {
    %c0_i32 = arith.constant 0 : i32
    %c0_i32_0 = arith.constant 0 : i32
    return %arg0, %c0_i32 : i32, i32
  }
  func.func @transform_2(%arg0: i32, %arg1: i32) -> (i32, i32) {
    %c0_i32 = arith.constant 0 : i32
    return %arg0, %arg1 : i32, i32
  }
  func.func @transform_3(%arg0: i32, %arg1: i32) -> (i32, i32) {
    %c0_i32 = arith.constant 0 : i32
    return %arg0, %arg1 : i32, i32
  }
  func.func @transform_4(%arg0: i32, %arg1: i32) -> (i32, i32) {
    %c0_i32 = arith.constant 0 : i32
    return %arg0, %arg1 : i32, i32
  }
  func.func @transform_5(%arg0: i32, %arg1: i32) -> (i32, i32) {
    %c0_i32 = arith.constant 0 : i32
    return %arg0, %arg1 : i32, i32
  }
}

</mosaic_0001>

<bundles_post_ra>
// kernel: tpu_custom_call.1
= control target key start
LH: loop header
LB: loop body
LE: loop exit
PB: predicated region body
PF: predicated region fallthrough
CT: control target
= control target key end

     0   :  { %11 = vsyncpa [#allocation3], 0  ;;  %s1053_s0 = inlined_call_operand.vmem [shape: f32[8,1], index: 0, kind: input, shape index: {}]   ;;  %s1054_s1 = inlined_call_operand.vmem [shape: f32[8,1], index: 1, kind: input, shape index: {}]   ;;  %s1055_s2 = inlined_call_operand.vmem [shape: f32[8,256], index: 2, kind: input, shape index: {}]   ;;  %s1056_s3 = inlined_call_operand.hbm [shape: f32[8,256], index: 3, kind: input, shape index: {}]   ;;  %s1057_s4 = inlined_call_operand.hbm [shape: f32[8,256], index: 4, kind: output, shape index: {0}]   ;;  %s1058_s5 = inlined_call_operand.hbm [shape: f32[8,256], index: 5, kind: output, shape index: {1}]  }
   0x1   :  { %13 = vsyncpa [#allocation3 + $0x1], 0 }
   0x2   :  { %14 = vsyncpa [#allocation4], 0 }
   0x3   :  { %16 = vsyncpa [#allocation4 + $0x1], 0 }
   0x4   :  { %17 = vsyncpa [#allocation7], 0 }
   0x5   :  { %19 = vsyncpa [#allocation7 + $0x1], 0  ;;  %s825_s18 = smov 0   ;;  %s827_s19 = smov 0  }
   0x6   :  { %s829_s20 = smov 0   ;;  %s831_s21 = smov 0  }
   0x7   :  { %s833_s22 = smov 0   ;;  %s835_s23 = smov 0  }
   0x8 LB: > { %s557_s24 = sadd.s32 4294967295, %s789_s23   ;;  %s558_s25 = sadd.s32 4294967294, %s789_s23   ;;  %s789_s23 = sphi %s835_s23, %s25_s23   ;;  %s785_s22 = sphi %s833_s22, %s1076_s22   ;;  %s781_s21 = sphi %s831_s21, %s1075_s21   ;;  %s777_s20 = sphi %s829_s20, %s1074_s20   ;;  %s773_s19 = sphi %s827_s19, %s1073_s19   ;;  %s769_s18 = sphi %s825_s18, %s1072_s18  }
   0x9   : > { %s34_s26 = sadd.s32 1, %s785_s22  ;;  %s126_s27 = sadd.s32 1, %s777_s20 }
   0xa   : > { %p35_p0 = scmp.ge.s32.totalorder %s34_s26, 2  ;;  %p133_p1 = scmp.ne.s32.totalorder %s777_s20, %s773_s19 }
   0xb   : > { %p134_p2 = scmp.eq.s32.totalorder %s789_s23, 0  ;;  %p139_p3 = scmp.ne.s32.totalorder %s773_s19, %s769_s18 }
   0xc   : > { %s1078_s26 = smov (%p35_p0, %s34_s26), 0  ;;  %p140_p5 = scmp.eq.s32.totalorder %s557_s24, 0 }
   0xd   : > { %p866_p4 = por %p134_p2, %p133_p1  ;;  %s122_s29 = ssub.s32 %s785_s22, %s1078_s26 }
   0xe   : > { %p165_p6 = scmp.eq.s32.totalorder %s557_s24, 1  ;;  %p124_p7 = scmp.eq.s32.totalorder %s122_s29, 0 }
   0xf   : > { %p872_p8 = por %p140_p5, %p139_p3  ;;  %p171_p10 = scmp.eq.s32.totalorder %s558_s25, 1 }
  0x10   : > { %p876_p9 = por %p165_p6, %p133_p1  ;;  %p593_p13 = scmp.lt.s32.totalorder %s789_s23, 2 }
  0x11   : > { %s881_s7 = scalar_select %p124_p7, %s777_s20, %s126_s27  }
  0x12   : > { %s1063_s6 = scalar_select %p876_p9, 1, 0 }
  0x13   : > { %p883_p11 = por %p171_p10, %p139_p3  ;;  %s244_s9 = sand.u32 1, %s777_s20  }
  0x14   : > { %s563_s10 = sshll.u32 %s244_s9, 3  ;;  %s564_s11 = sshll.u32 %s785_s22, 7 }
  0x15   : > { %s1064_s8 = scalar_select %p883_p11, 1, 0 }
  0x16   : > { %s894_s14 = scalar_lea.hbm %s1056_s3, %s564_s11  ;;  %s248_s15 = scalar_lea.vmem [#allocation2], %s563_s10 }
  0x17   : > { %s257_s16 = sshll.u32 %s248_s15, 4  ;;  %p900_p0 = pnand %p593_p13, %p866_p4  ;;  %s896_s16 = int_to_ptr.vmem [resolvable:$true] %s257_s16 }
  0x18   : > { %s245_s24 = scalar_lea.sflag [#allocation3], %s244_s9  ;;  %s645_s25 = scalar_lea.hbm %s894_s14, 128 }
  0x19   : > { %p646_p3 = scmp.ne.s32.totalorder %s894_s14, %s645_s25  ;;  %p647_p5 = pneg %p900_p0 }
  0x1a   : > { %s650_s28 = scalar_lea.hbm %s1056_s3, 256  ;;  %p651_p4 = scmp.lt.u32.totalorder %s894_s14, %s1056_s3 }
  0x1b   : > { %p648_p6 = pnand %p647_p5, %p646_p3  ;;  %p652_p10 = scmp.lt.u32.totalorder %s650_s28, %s645_s25 }
  0x1c   : > { %p654_p12 = scmp.lt.u32.totalorder %s645_s25, %s894_s14 }
  0x1d   : > { %p649_p7 = pneg %p648_p6  ;;  %p653_p13 = por %p652_p10, %p651_p4 }
  0x1f   : > { %p655_p1 = por %p654_p12, %p653_p13 }
  0x21   : > { %p656_p2 = pnand %p655_p1, %p649_p7 }
  0x23   : > { %659 = shalt.err (!%p656_p2)
}
  0x24   : > { %s660_s9 = scalar_lea.vmem %s896_s16, 128  ;;  %s791_s12 = smov [#allocation2]  }
  0x25   : > { %p661_p3 = scmp.ne.s32.totalorder %s896_s16, %s660_s9  ;;  %s665_s13 = sshll.u32 %s791_s12, 4  ;;  %s666_s13 = int_to_ptr.vmem [resolvable:$false] %s665_s13 }
  0x26   : > { %s667_s15 = scalar_lea.vmem %s666_s13, 256  ;;  %p668_p9 = scmp.lt.s32.totalorder %s896_s16, %s666_s13 }
  0x27   : > { %p663_p6 = pnand %p661_p3, %p647_p5  ;;  %p669_p4 = scmp.lt.s32.totalorder %s667_s15, %s660_s9 }
  0x29   : > { %p664_p11 = pneg %p663_p6  ;;  %p670_p10 = por %p669_p4, %p668_p9 }
  0x2b   : > { %p671_p12 = pnand %p670_p10, %p664_p11 }
  0x2d   : > { %674 = shalt.err (!%p671_p12)
}
  0x2e   : > { %585 = dma.hbm_to_vmem [thread:$0]  (!%p900_p0), %s894_s14, 128, %s896_s16, %s245_s24  }
  0x2f   : > { %p1066_p1 = scmp.lt.s32.totalorder %s789_s23, 3  ;;  %p1067_p2 = scmp.ge.s32.totalorder %s789_s23, 1 }
  0x31   : > { %p263_p5 = pnand %p1067_p2, %p1066_p1 }
  0x32   : > { %s936_s25 = sand.u32 (!%p263_p5), 1, %s773_s19  }
  0x33   : > { %266 = sbr.rel (%p263_p5) target bundleno = 231 (0xe7), region = 36  ;;  %s939_s27 = sshll.u32 (!%p263_p5), %s936_s25, 3 }
  0x34   : > { %s269_s29 = scalar_lea.sflag (!%p263_p5), [#allocation3], %s936_s25  ;;  %s272_s17 = scalar_lea.vmem (!%p263_p5), [#allocation2], %s939_s27 }
  0x3a   : > { %756 = dma.done.wait (%p872_p8), %s269_s29, 128  }
  0x3b   : > { %758 = vsyncadd (%p872_p8), %s269_s29, 4294967168  ;;  %v792_v0 = vmov 0   ;;  %v339_v1 = vld [vmem:[%s1053_s0] sm:$0xff]  ;;  %p330_p8 = scmp.lt.s32.totalorder %s781_s21, 1  ;;  %s572_s13 = sshll.u32 %s781_s21, 7 }
  0x3c   : > { %644 = vset.pattern.permute.xlu0 %v792_v0  ;;  %v341_v2 = vld [vmem:[%s1054_s1] sm:$0xff]  ;;  %vm340_vm0 = vcmp.gt.f32.partialorder %v339_v1, 0.0  ;;  %s312_s15 = scalar_lea.vmem [#allocation5], %s939_s27  ;;  %s965_s24 = scalar_lea.hbm %s1057_s4, %s572_s13 }
  0x3d   : > { %vm342_vm1 = vcmp.gt.f32.partialorder %v341_v2, 0.0  ;;  %v343_v3 = vsel %vm340_vm0, 1, %v792_v0  ;;  %s331_s30 = scalar_select %p330_p8, %s781_s21, 1  ;;  %v337_v6 = vld [vmem:[%s272_s17] sm:$0xff] }
  0x3e   : > { %345 = vperm.xlu0 %644, %v343_v3   ;;  %v350_v4 = vsel %vm342_vm1, 1, %v792_v0  ;;  %s378_s29 = sshll.u32 %s312_s15, 4  ;;  %s1060_s17 = scalar_lea.vmem [#allocation6], %s939_s27  ;;  %s967_s29 = int_to_ptr.vmem [resolvable:$true] %s378_s29 }
  0x3f   : > { %s569_s10 = sshll.u32 %s331_s30, 3  ;;  %s972_s28 = sshll.u32 %s1060_s17, 4  ;;  %s1004_s28 = int_to_ptr.vmem [resolvable:$true] %s972_s28 }
  0x40   : > { %s335_s12 = scalar_lea.vmem %s1055_s2, %s569_s10  ;;  %s358_s30 = scalar_lea.sflag [#allocation4], %s936_s25 }
  0x41   : > { %v336_v5 = vld [vmem:[%s335_s12] sm:$0xff]  ;;  %s675_s10 = scalar_lea.vmem %s967_s29, 128  ;;  %p1068_p11 = scmp.ne.s32.totalorder %s1063_s6, 0 }
  0x42   : > { %352 = vperm.xlu0 %644, %v350_v4   ;;  %v338_v7 = vmul.f32 %v337_v6, %v336_v5  ;;  %p676_p9 = scmp.ne.s32.totalorder %s967_s29, %s675_s10  ;;  %s793_s11 = smov [#allocation5]  }
  0x43   : > { %s679_s9 = sshll.u32 %s793_s11, 4  ;;  %s680_s9 = int_to_ptr.vmem [resolvable:$false] %s679_s9 }
  0x44   : > { %p677_p0 = pnand %p676_p9, %p1068_p11  ;;  %s681_s12 = scalar_lea.vmem %s680_s9, 256 }
  0x45   : > { %p682_p13 = scmp.lt.s32.totalorder %s967_s29, %s680_s9  ;;  %p683_p3 = scmp.lt.s32.totalorder %s681_s12, %s675_s10 }
  0x46   : > { %p678_p7 = pneg %p677_p0 }
  0x47   : > { %p684_p6 = por %p683_p3, %p682_p13 }
  0x49   : > { %p685_p4 = pnand %p684_p6, %p678_p7 }
  0xbd   : > { %v346_v8 = vpop.permute.xlu0 %345 }
  0xbe   : > { %vm347_vm2 = vcmp.eq.s32.totalorder %v346_v8, 1 }
  0xbf   : > { %v348_v9 = vsel %vm347_vm2, %v336_v5, %v338_v7 }
  0xc0   : > { %349 = vst [vmem:[%s312_s15] sm:$0xff] %v348_v9 }
  0xc1   : > { %v353_v10 = vpop.permute.xlu0 %352 }
  0xc2   : > { %688 = shalt.err (!%p685_p4)
}
  0xc3   : > { %s689_s15 = scalar_lea.hbm %s965_s24, 128  ;;  %s693_s11 = scalar_lea.hbm %s1057_s4, 256 }
  0xc4   : > { %p690_p10 = scmp.ne.s32.totalorder %s965_s24, %s689_s15  ;;  %p694_p2 = scmp.lt.u32.totalorder %s965_s24, %s1057_s4 }
  0xc5   : > { %p695_p5 = scmp.lt.u32.totalorder %s693_s11, %s689_s15  ;;  %p697_p9 = scmp.lt.u32.totalorder %s689_s15, %s965_s24 }
  0xc6   : > { %p691_p12 = pnand %p690_p10, %p1068_p11 }
  0xc7   : > { %p696_p8 = por %p695_p5, %p694_p2 }
  0xc8   : > { %p692_p1 = pneg %p691_p12 }
  0xc9   : > { %p698_p0 = por %p697_p9, %p696_p8 }
  0xcb   : > { %p699_p7 = pnand %p698_p0, %p692_p1 }
  0xcd   : > { %702 = shalt.err (!%p699_p7)
}
  0xce   : > { %578 = dma.vmem_to_hbm [thread:$0]  (%p1068_p11), %s967_s29, 128, %s965_s24, %s358_s30   ;;  %vm354_vm3 = vcmp.eq.s32.totalorder %v353_v10, 1 }
  0xcf   : > { %s1001_s12 = scalar_lea.hbm %s1058_s5, %s572_s13  ;;  %v355_v11 = vsel %vm354_vm3, %v337_v6, %v338_v7  ;;  %s1069_s15 = scalar_lea.vmem [#allocation6], %s939_s27 }
  0xd0   : > { %356 = vst [vmem:[%s1069_s15] sm:$0xff] %v355_v11  ;;  %s363_s14 = scalar_lea.sflag [#allocation7], %s936_s25  ;;  %s703_s16 = scalar_lea.vmem %s1004_s28, 128 }
  0xd1   : > { %p704_p13 = scmp.ne.s32.totalorder %s1004_s28, %s703_s16  ;;  %s794_s21 = smov [#allocation6]  }
  0xd2   : > { %s707_s29 = sshll.u32 %s794_s21, 4  ;;  %s708_s29 = int_to_ptr.vmem [resolvable:$false] %s707_s29 }
  0xd3   : > { %p705_p3 = pnand %p704_p13, %p1068_p11  ;;  %s709_s24 = scalar_lea.vmem %s708_s29, 256 }
  0xd4   : > { %p710_p4 = scmp.lt.s32.totalorder %s1004_s28, %s708_s29  ;;  %p711_p10 = scmp.lt.s32.totalorder %s709_s24, %s703_s16 }
  0xd5   : > { %p706_p6 = pneg %p705_p3 }
  0xd6   : > { %p712_p12 = por %p711_p10, %p710_p4 }
  0xd8   : > { %p713_p1 = pnand %p712_p12, %p706_p6 }
  0xda   : > { %716 = shalt.err (!%p713_p1)
}
  0xdb   : > { %s717_s25 = scalar_lea.hbm %s1001_s12, 128  ;;  %s721_s30 = scalar_lea.hbm %s1058_s5, 256 }
  0xdc   : > { %p718_p2 = scmp.ne.s32.totalorder %s1001_s12, %s717_s25  ;;  %p722_p9 = scmp.lt.u32.totalorder %s1001_s12, %s1058_s5 }
  0xdd   : > { %p723_p0 = scmp.lt.u32.totalorder %s721_s30, %s717_s25  ;;  %p725_p13 = scmp.lt.u32.totalorder %s717_s25, %s1001_s12 }
  0xde   : > { %p719_p5 = pnand %p718_p2, %p1068_p11 }
  0xdf   : > { %p724_p7 = por %p723_p0, %p722_p9 }
  0xe0   : > { %p720_p8 = pneg %p719_p5 }
  0xe1   : > { %p726_p3 = por %p725_p13, %p724_p7 }
  0xe3   : > { %p727_p6 = pnand %p726_p3, %p720_p8 }
  0xe5   : > { %730 = shalt.err (!%p727_p6)
}
  0xe6   : > { %579 = dma.vmem_to_hbm [thread:$0]  (%p1068_p11), %s1004_s28, 128, %s1001_s12, %s363_s14  }
  0xe7 PF: > { %s405_s17 = sand.u32 1, %s769_s18   ;;  %p1070_p4 = scmp.ne.s32.totalorder %s1064_s8, 0 }
  0xe8   : > { %p1071_p10 = scmp.ge.s32.totalorder %s789_s23, 2  ;;  %s406_s10 = scalar_lea.sflag [#allocation4], %s405_s17 }
  0xea   : > { %p587_p12 = pnand %p1071_p10, %p1070_p4 }
  0xec   : > { %760 = dma.done.wait (!%p587_p12), %s406_s10, 128  }
  0xed   : > { %762 = vsyncadd (!%p587_p12), %s406_s10, 4294967168  ;;  %s415_s15 = scalar_lea.sflag [#allocation7], %s405_s17 }
  0xee   : > { %764 = dma.done.wait (!%p587_p12), %s415_s15, 128  }
  0xef   : > { %766 = vsyncadd (!%p587_p12), %s415_s15, 4294967168  ;;  %s25_s23 = sadd.s32 1, %s789_s23   ;;  %s1072_s18 = smov %s773_s19 }
  0xf0   : > { %p22_p1 = scmp.ge.s32.totalorder %s25_s23, 4   ;;  %s1073_s19 = smov %s777_s20 }
  0xf1   : > { %s1074_s20 = smov %s881_s7  ;;  %s1075_s21 = smov %s785_s22 }
  0xf2   : > { %s1076_s22 = smov %s1078_s26  ;;  %24 = sbr.rel (!%p22_p1) target bundleno = 8 (0x8), region = 107 }
  0xf9   :  { %420 = vsyncpa [#allocation3], 1 }
  0xfa   :  { %422 = vsyncpa [#allocation3 + $0x1], 1 }
  0xfb   :  { %423 = vsyncpa [#allocation4], 1 }
  0xfc   :  { %425 = vsyncpa [#allocation4 + $0x1], 1 }
  0xfd   :  { %426 = vsyncpa [#allocation7], 1 }
  0xfe   :  { %428 = vsyncpa [#allocation7 + $0x1], 1 }

</bundles_post_ra>
